<compile_context>
chip_gen: v7x
topology: tpu7x:2x2x1
jax: 0.10.0
libtpu: 0.0.40
codegen_flags: <defaults>
</compile_context>

<pallas_src>
import math

import jax
import jax.numpy as jnp
from jax.experimental import pallas as pl
from jax.experimental.pallas import tpu as pltpu

# ---- synthetic module hyper-parameters (FLAGS / constructor args) ----------
POSENC_DIM = 32              # FLAGS.field_posenc_dim
GPS_HIDDEN = 32              # hidden width of the (externally supplied) gps_net
GPS_OUT    = 48              # gps_net output width (>= POSENC_DIM, sliced [:POSENC_DIM])
LAYER_DIMS = (32, 32, 4)     # pred_mlp layer_dims
OUT_DIM    = LAYER_DIMS[-1]

PACK       = 4               # points packed along the lane axis (4*32 = 128 lanes)
MAX_TILE_M = 1024            # packed rows per grid step (= 4096 points); sweepable


# ---------------- exact-GELU helper (usable inside the kernel) --------------
def _gelu_exact(x):
    # PyTorch nn.GELU() default = exact erf form.  erf via Abramowitz & Stegun
    # 7.1.26 polynomial (max abs err ~1.5e-7), algebraically rearranged so no
    # sign()/select is needed:
    #   gelu(x) = relu(x) - 0.5*|x| * poly(t) * exp(-z^2),   z = x / sqrt(2)
    # The 1/(1 + p*|z|) divide rides the EUP slot via pl.reciprocal(approx=True)
    # plus one Newton step to restore ~f32 accuracy (keeps 1e-3 parity safe).
    # TODO(synk): PyTorch uses hardware-exact erf; this is a ~1e-7 polynomial.
    a1, a2, a3, a4, a5 = 0.254829592, -0.284496736, 1.421413741, -1.453152027, 1.061405429
    p = 0.3275911
    ax = jnp.abs(x)
    az = ax * 0.7071067811865476
    d = 1.0 + p * az
    t = pl.reciprocal(d, approx=True)          # EUP vrcp (separate VLIW slot)
    t = t * (2.0 - d * t)                      # one Newton step -> ~f32 accurate
    poly = ((((a5 * t + a4) * t + a3) * t + a2) * t + a1) * t
    tail = (0.5 * ax) * poly * jnp.exp(-az * az)   # exp on EUP (free slot)
    return jnp.maximum(x, 0.0) - tail


# ------------------------------- kernel -------------------------------------
def gps_field_kernel(x_ref,
                     gw1_ref, gb1_ref, gw2_ref, gb2_ref,   # gps_net (block-diag packed)
                     pw0_ref, pb0_ref, pw1_ref, pb1_ref, pw2_ref, pb2_ref,  # pred_mlp
                     o_ref):
    x = x_ref[...]                                          # (tile_m, PACK*3)

    # gps_net: Linear(3,H) -> GELU -> Linear(H,P)   [P-slice + rse*0.1 scale
    # are folded into gw2/gb2 in the wrapper — exact equivalent]
    h = _gelu_exact(jnp.dot(x, gw1_ref[...],
                            preferred_element_type=jnp.float32) + gb1_ref[...])
    lbo = jnp.dot(h, gw2_ref[...],
                  preferred_element_type=jnp.float32) + gb2_ref[...]   # (tile_m, 128)

    # pred_mlp: Linear -> GELU -> Linear -> GELU -> Linear   (all 128-lane dense)
    y = _gelu_exact(jnp.dot(lbo, pw0_ref[...],
                            preferred_element_type=jnp.float32) + pb0_ref[...])
    y = _gelu_exact(jnp.dot(y, pw1_ref[...],
                            preferred_element_type=jnp.float32) + pb1_ref[...])
    y = jnp.dot(y, pw2_ref[...],
                preferred_element_type=jnp.float32) + pb2_ref[...]      # (tile_m, PACK*OUT)

    o_ref[...] = y.astype(o_ref.dtype)


# ------------------------------- wrapper -------------------------------------
def gps_field_forward(inp, packed_params):
    """inp: (..., 3) float32.  Returns (..., OUT_DIM).  Uses pack_params() output."""
    (gw1, gb1, gw2, gb2, pw0, pb0, pw1, pb1, pw2, pb2) = packed_params

    lead_shape = inp.shape[:-1]
    m = math.prod(lead_shape)
    x = inp.reshape(m, 3)

    mp = pl.cdiv(m, PACK)                              # packed rows needed
    # Big tiles amortize per-step overhead; keep >= 2 tiles so v7x's two
    # TensorCores both get work on the "parallel" grid axis.
    tile_m = min(MAX_TILE_M, pl.cdiv(mp, 2))
    tile_m = max(8, ((tile_m + 7) // 8) * 8)           # (8,128) sublane rule
    mp_pad = pl.cdiv(mp, tile_m) * tile_m
    n_tiles = mp_pad // tile_m

    m_pad = mp_pad * PACK
    if m_pad != m:
        x = jnp.pad(x, ((0, m_pad - m), (0, 0)))
    xp = x.reshape(mp_pad, PACK * 3)                   # free contiguous reshape

    def const2d(arr):
        # weight/bias blocks: constant index_map -> loaded once, kept resident
        return pl.BlockSpec(arr.shape, lambda i: (0, 0))

    grid_spec = pltpu.PrefetchScalarGridSpec(
        num_scalar_prefetch=0,
        grid=(n_tiles,),
        in_specs=[
            pl.BlockSpec((tile_m, PACK * 3), lambda i: (i, 0)),   # packed x tile
            const2d(gw1), const2d(gb1), const2d(gw2), const2d(gb2),
            const2d(pw0), const2d(pb0), const2d(pw1), const2d(pb1),
            const2d(pw2), const2d(pb2),
        ],
        out_specs=pl.BlockSpec((tile_m, PACK * OUT_DIM), lambda i: (i, 0)),
    )

    out = pl.pallas_call(
        gps_field_kernel,
        out_shape=jax.ShapeDtypeStruct((mp_pad, PACK * OUT_DIM), jnp.float32),
        grid_spec=grid_spec,
        compiler_params=pltpu.CompilerParams(
            dimension_semantics=("parallel",)),
    )(xp, gw1, gb1, gw2, gb2, pw0, pb0, pw1, pb1, pw2, pb2)

    out = out.reshape(m_pad, OUT_DIM)[:m]              # free unpack + trim
    return out.reshape(lead_shape + (OUT_DIM,))


# --------------------------- parameter construction --------------------------
def make_params(key):
    """Logical (PyTorch-equivalent) parameters."""
    ks = jax.random.split(key, 8)

    def lin(k, fan_in, fan_out):
        kw, kb = jax.random.split(k)
        bound = 1.0 / math.sqrt(fan_in)
        w = jax.random.uniform(kw, (fan_in, fan_out), jnp.float32, -bound, bound)
        b = jax.random.uniform(kb, (1, fan_out), jnp.float32, -bound, bound)
        return w, b

    # gps_net (externally-supplied submodule): Linear(3,H) -> GELU -> Linear(H,GPS_OUT)
    gw1, gb1 = lin(ks[0], 3, GPS_HIDDEN)
    gw2_full, gb2_full = lin(ks[1], GPS_HIDDEN, GPS_OUT)
    # fold the forward's `[..., :posenc_dim]` slice into the weights (exact)
    gw2 = gw2_full[:, :POSENC_DIM]
    gb2 = gb2_full[:, :POSENC_DIM]

    # r_sqrt_eigva buffer: rsqrt of eigenvalues[1:]
    # TODO(synk): original loads canonical_eigval3.npy; replaced with synthetic
    # positive eigenvalues since no file I/O is allowed.
    eigval = 0.5 + 0.37 * jnp.arange(GPS_OUT + 1, dtype=jnp.float32)
    r_sqrt_eigva = jax.lax.rsqrt(eigval[1:])
    rse = r_sqrt_eigva[:POSENC_DIM].reshape(1, POSENC_DIM)

    # pred_mlp: Linear(P,D0) GELU Linear(D0,D1) GELU Linear(D1,D2)
    pw0, pb0 = lin(ks[2], POSENC_DIM, LAYER_DIMS[0])
    pw1, pb1 = lin(ks[3], LAYER_DIMS[0], LAYER_DIMS[1])
    pw2, pb2 = lin(ks[4], LAYER_DIMS[1], LAYER_DIMS[2])

    return (gw1, gb1, gw2, gb2, rse, pw0, pb0, pw1, pb1, pw2, pb2)


def _block_diag(w, n):
    k, o = w.shape
    bd = jnp.zeros((n * k, n * o), w.dtype)
    for j in range(n):
        bd = bd.at[j * k:(j + 1) * k, j * o:(j + 1) * o].set(w)
    return bd


def pack_params(params):
    """One-time prep: fold rse*0.1 into gw2/gb2, then block-diag pack PACK copies
    so hidden activations are 128-lane dense inside the kernel."""
    (gw1, gb1, gw2, gb2, rse, pw0, pb0, pw1, pb1, pw2, pb2) = params
    scale = rse * 0.1                       # (1, POSENC_DIM) diagonal scale
    gw2s = gw2 * scale                      # exact commute of the diag scale
    gb2s = gb2 * scale

    def tb(b):
        return jnp.tile(b, (1, PACK))

    return (
        _block_diag(gw1, PACK), tb(gb1),
        _block_diag(gw2s, PACK), tb(gb2s),
        _block_diag(pw0, PACK), tb(pb0),
        _block_diag(pw1, PACK), tb(pb1),
        _block_diag(pw2, PACK), tb(pb2),
    )


# ------------------------------ pure-JAX reference ---------------------------
def gps_field_reference(inp, params):
    (gw1, gb1, gw2, gb2, rse, pw0, pb0, pw1, pb1, pw2, pb2) = params
    x = inp.reshape(-1, 3)
    g = jax.nn.gelu(x @ gw1 + gb1, approximate=False)
    lbo = g @ gw2 + gb2
    lbo = lbo * rse * 0.1
    y = jax.nn.gelu(lbo @ pw0 + pb0, approximate=False)
    y = jax.nn.gelu(y @ pw1 + pb1, approximate=False)
    y = y @ pw2 + pb2
    return y.reshape(inp.shape[:-1] + (OUT_DIM,))


if __name__ == "__main__":
    key = jax.random.PRNGKey(0)
    k_param, k_inp = jax.random.split(key)

    params = make_params(k_param)
    packed = pack_params(params)

    # small point cloud: batch=2, 128 points, 3D coords
    inp = jax.random.normal(k_inp, (2, 128, 3), dtype=jnp.float32)

    out = gps_field_forward(inp, packed)
    out = jax.block_until_ready(out)

    ref = gps_field_reference(inp, params)
    assert out.shape == ref.shape == (2, 128, OUT_DIM)
    err = float(jnp.max(jnp.abs(out - ref)))
    assert err < 1e-3, f"mismatch vs reference: {err}"

    print("KERNEL_OK")
</pallas_src>

<mosaic_0001>
module attributes {stable_mosaic.version = 11 : i64} {
  func.func @gps_field_kernel(%arg0: i32, %arg1: memref<32x12xf32, #tpu.memory_space<vmem>>, %arg2: memref<12x128xf32, #tpu.memory_space<vmem>>, %arg3: memref<1x128xf32, #tpu.memory_space<vmem>>, %arg4: memref<128x128xf32, #tpu.memory_space<vmem>>, %arg5: memref<1x128xf32, #tpu.memory_space<vmem>>, %arg6: memref<128x128xf32, #tpu.memory_space<vmem>>, %arg7: memref<1x128xf32, #tpu.memory_space<vmem>>, %arg8: memref<128x128xf32, #tpu.memory_space<vmem>>, %arg9: memref<1x128xf32, #tpu.memory_space<vmem>>, %arg10: memref<128x16xf32, #tpu.memory_space<vmem>>, %arg11: memref<1x16xf32, #tpu.memory_space<vmem>>, %arg12: memref<32x16xf32, #tpu.memory_space<vmem>>) attributes {dimension_semantics = [#tpu.dimension_semantics<parallel>], iteration_bounds = array<i64: 2>, scalar_prefetch = 0 : i64, scratch_operands = 0 : i64, tpu.core_type = #tpu.core_type<tc>, window_params = [{transform_indices = @transform_0, window_bounds = array<i64: 32, 12>}, {pipeline_mode = #tpu.pipeline_mode<synchronous>, transform_indices = @transform_1, window_bounds = array<i64: 12, 128>}, {pipeline_mode = #tpu.pipeline_mode<synchronous>, transform_indices = @transform_2, window_bounds = array<i64: 1, 128>}, {pipeline_mode = #tpu.pipeline_mode<synchronous>, transform_indices = @transform_3, window_bounds = array<i64: 128, 128>}, {pipeline_mode = #tpu.pipeline_mode<synchronous>, transform_indices = @transform_4, window_bounds = array<i64: 1, 128>}, {pipeline_mode = #tpu.pipeline_mode<synchronous>, transform_indices = @transform_5, window_bounds = array<i64: 128, 128>}, {pipeline_mode = #tpu.pipeline_mode<synchronous>, transform_indices = @transform_6, window_bounds = array<i64: 1, 128>}, {pipeline_mode = #tpu.pipeline_mode<synchronous>, transform_indices = @transform_7, window_bounds = array<i64: 128, 128>}, {pipeline_mode = #tpu.pipeline_mode<synchronous>, transform_indices = @transform_8, window_bounds = array<i64: 1, 128>}, {pipeline_mode = #tpu.pipeline_mode<synchronous>, transform_indices = @transform_9, window_bounds = array<i64: 128, 16>}, {pipeline_mode = #tpu.pipeline_mode<synchronous>, transform_indices = @transform_10, window_bounds = array<i64: 1, 16>}, {transform_indices = @transform_11, window_bounds = array<i64: 32, 16>}]} {
    %c0 = arith.constant 0 : index
    %c0_0 = arith.constant 0 : index
    %0 = vector.load %arg1[%c0, %c0_0] : memref<32x12xf32, #tpu.memory_space<vmem>>, vector<32x12xf32>
    %c0_1 = arith.constant 0 : index
    %c0_2 = arith.constant 0 : index
    %1 = vector.load %arg2[%c0_1, %c0_2] : memref<12x128xf32, #tpu.memory_space<vmem>>, vector<12x128xf32>
    %cst = arith.constant dense<0.000000e+00> : vector<32x128xf32>
    %2 = tpu.matmul %0, %1, %cst {dimension_numbers = #tpu.dot_dimension_numbers<[1], [0], [0], [1], [0, 0, 1, 1], [], []>} : vector<32x12xf32>, vector<12x128xf32>, vector<32x128xf32> -> vector<32x128xf32>
    %c0_3 = arith.constant 0 : index
    %c0_4 = arith.constant 0 : index
    %3 = vector.load %arg3[%c0_3, %c0_4] : memref<1x128xf32, #tpu.memory_space<vmem>>, vector<1x128xf32>
    %4 = vector.broadcast %3 : vector<1x128xf32> to vector<32x128xf32>
    %5 = arith.addf %2, %4 : vector<32x128xf32>
    %6 = math.absf %5 : vector<32x128xf32>
    %cst_5 = arith.constant 0.707106769 : f32
    %7 = vector.broadcast %cst_5 : f32 to vector<32x128xf32>
    %8 = arith.mulf %6, %7 : vector<32x128xf32>
    %cst_6 = arith.constant 0.327591091 : f32
    %9 = vector.broadcast %cst_6 : f32 to vector<32x128xf32>
    %10 = arith.mulf %9, %8 : vector<32x128xf32>
    %cst_7 = arith.constant 1.000000e+00 : f32
    %11 = vector.broadcast %cst_7 : f32 to vector<32x128xf32>
    %12 = arith.addf %11, %10 : vector<32x128xf32>
    %13 = tpu.reciprocal %12 {approx = true} : vector<32x128xf32> -> vector<32x128xf32>
    %14 = arith.mulf %12, %13 : vector<32x128xf32>
    %cst_8 = arith.constant 2.000000e+00 : f32
    %15 = vector.broadcast %cst_8 : f32 to vector<32x128xf32>
    %16 = arith.subf %15, %14 : vector<32x128xf32>
    %17 = arith.mulf %13, %16 : vector<32x128xf32>
    %cst_9 = arith.constant 1.06140542 : f32
    %18 = vector.broadcast %cst_9 : f32 to vector<32x128xf32>
    %19 = arith.mulf %18, %17 : vector<32x128xf32>
    %cst_10 = arith.constant -1.45315206 : f32
    %20 = vector.broadcast %cst_10 : f32 to vector<32x128xf32>
    %21 = arith.addf %19, %20 : vector<32x128xf32>
    %22 = arith.mulf %21, %17 : vector<32x128xf32>
    %cst_11 = arith.constant 1.42141378 : f32
    %23 = vector.broadcast %cst_11 : f32 to vector<32x128xf32>
    %24 = arith.addf %22, %23 : vector<32x128xf32>
    %25 = arith.mulf %24, %17 : vector<32x128xf32>
    %cst_12 = arith.constant -0.284496725 : f32
    %26 = vector.broadcast %cst_12 : f32 to vector<32x128xf32>
    %27 = arith.addf %25, %26 : vector<32x128xf32>
    %28 = arith.mulf %27, %17 : vector<32x128xf32>
    %cst_13 = arith.constant 0.254829586 : f32
    %29 = vector.broadcast %cst_13 : f32 to vector<32x128xf32>
    %30 = arith.addf %28, %29 : vector<32x128xf32>
    %31 = arith.mulf %30, %17 : vector<32x128xf32>
    %cst_14 = arith.constant 5.000000e-01 : f32
    %32 = vector.broadcast %cst_14 : f32 to vector<32x128xf32>
    %33 = arith.mulf %32, %6 : vector<32x128xf32>
    %34 = arith.mulf %33, %31 : vector<32x128xf32>
    %cst_15 = arith.constant 0.000000e+00 : f32
    %35 = vector.broadcast %cst_15 : f32 to vector<32x128xf32>
    %36 = arith.subf %35, %8 : vector<32x128xf32>
    %37 = arith.mulf %36, %8 : vector<32x128xf32>
    %38 = math.exp %37 : vector<32x128xf32>
    %39 = arith.mulf %34, %38 : vector<32x128xf32>
    %cst_16 = arith.constant 0.000000e+00 : f32
    %40 = vector.broadcast %cst_16 : f32 to vector<32x128xf32>
    %41 = arith.maximumf %5, %40 : vector<32x128xf32>
    %42 = arith.subf %41, %39 : vector<32x128xf32>
    %c0_17 = arith.constant 0 : index
    %c0_18 = arith.constant 0 : index
    %43 = vector.load %arg4[%c0_17, %c0_18] : memref<128x128xf32, #tpu.memory_space<vmem>>, vector<128x128xf32>
    %cst_19 = arith.constant dense<0.000000e+00> : vector<32x128xf32>
    %44 = tpu.matmul %42, %43, %cst_19 {dimension_numbers = #tpu.dot_dimension_numbers<[1], [0], [0], [1], [0, 0, 1, 1], [], []>} : vector<32x128xf32>, vector<128x128xf32>, vector<32x128xf32> -> vector<32x128xf32>
    %c0_20 = arith.constant 0 : index
    %c0_21 = arith.constant 0 : index
    %45 = vector.load %arg5[%c0_20, %c0_21] : memref<1x128xf32, #tpu.memory_space<vmem>>, vector<1x128xf32>
    %46 = vector.broadcast %45 : vector<1x128xf32> to vector<32x128xf32>
    %47 = arith.addf %44, %46 : vector<32x128xf32>
    %c0_22 = arith.constant 0 : index
    %c0_23 = arith.constant 0 : index
    %48 = vector.load %arg6[%c0_22, %c0_23] : memref<128x128xf32, #tpu.memory_space<vmem>>, vector<128x128xf32>
    %cst_24 = arith.constant dense<0.000000e+00> : vector<32x128xf32>
    %49 = tpu.matmul %47, %48, %cst_24 {dimension_numbers = #tpu.dot_dimension_numbers<[1], [0], [0], [1], [0, 0, 1, 1], [], []>} : vector<32x128xf32>, vector<128x128xf32>, vector<32x128xf32> -> vector<32x128xf32>
    %c0_25 = arith.constant 0 : index
    %c0_26 = arith.constant 0 : index
    %50 = vector.load %arg7[%c0_25, %c0_26] : memref<1x128xf32, #tpu.memory_space<vmem>>, vector<1x128xf32>
    %51 = vector.broadcast %50 : vector<1x128xf32> to vector<32x128xf32>
    %52 = arith.addf %49, %51 : vector<32x128xf32>
    %53 = math.absf %52 : vector<32x128xf32>
    %cst_27 = arith.constant 0.707106769 : f32
    %54 = vector.broadcast %cst_27 : f32 to vector<32x128xf32>
    %55 = arith.mulf %53, %54 : vector<32x128xf32>
    %cst_28 = arith.constant 0.327591091 : f32
    %56 = vector.broadcast %cst_28 : f32 to vector<32x128xf32>
    %57 = arith.mulf %56, %55 : vector<32x128xf32>
    %cst_29 = arith.constant 1.000000e+00 : f32
    %58 = vector.broadcast %cst_29 : f32 to vector<32x128xf32>
    %59 = arith.addf %58, %57 : vector<32x128xf32>
    %60 = tpu.reciprocal %59 {approx = true} : vector<32x128xf32> -> vector<32x128xf32>
    %61 = arith.mulf %59, %60 : vector<32x128xf32>
    %cst_30 = arith.constant 2.000000e+00 : f32
    %62 = vector.broadcast %cst_30 : f32 to vector<32x128xf32>
    %63 = arith.subf %62, %61 : vector<32x128xf32>
    %64 = arith.mulf %60, %63 : vector<32x128xf32>
    %cst_31 = arith.constant 1.06140542 : f32
    %65 = vector.broadcast %cst_31 : f32 to vector<32x128xf32>
    %66 = arith.mulf %65, %64 : vector<32x128xf32>
    %cst_32 = arith.constant -1.45315206 : f32
    %67 = vector.broadcast %cst_32 : f32 to vector<32x128xf32>
    %68 = arith.addf %66, %67 : vector<32x128xf32>
    %69 = arith.mulf %68, %64 : vector<32x128xf32>
    %cst_33 = arith.constant 1.42141378 : f32
    %70 = vector.broadcast %cst_33 : f32 to vector<32x128xf32>
    %71 = arith.addf %69, %70 : vector<32x128xf32>
    %72 = arith.mulf %71, %64 : vector<32x128xf32>
    %cst_34 = arith.constant -0.284496725 : f32
    %73 = vector.broadcast %cst_34 : f32 to vector<32x128xf32>
    %74 = arith.addf %72, %73 : vector<32x128xf32>
    %75 = arith.mulf %74, %64 : vector<32x128xf32>
    %cst_35 = arith.constant 0.254829586 : f32
    %76 = vector.broadcast %cst_35 : f32 to vector<32x128xf32>
    %77 = arith.addf %75, %76 : vector<32x128xf32>
    %78 = arith.mulf %77, %64 : vector<32x128xf32>
    %cst_36 = arith.constant 5.000000e-01 : f32
    %79 = vector.broadcast %cst_36 : f32 to vector<32x128xf32>
    %80 = arith.mulf %79, %53 : vector<32x128xf32>
    %81 = arith.mulf %80, %78 : vector<32x128xf32>
    %cst_37 = arith.constant 0.000000e+00 : f32
    %82 = vector.broadcast %cst_37 : f32 to vector<32x128xf32>
    %83 = arith.subf %82, %55 : vector<32x128xf32>
    %84 = arith.mulf %83, %55 : vector<32x128xf32>
    %85 = math.exp %84 : vector<32x128xf32>
    %86 = arith.mulf %81, %85 : vector<32x128xf32>
    %cst_38 = arith.constant 0.000000e+00 : f32
    %87 = vector.broadcast %cst_38 : f32 to vector<32x128xf32>
    %88 = arith.maximumf %52, %87 : vector<32x128xf32>
    %89 = arith.subf %88, %86 : vector<32x128xf32>
    %c0_39 = arith.constant 0 : index
    %c0_40 = arith.constant 0 : index
    %90 = vector.load %arg8[%c0_39, %c0_40] : memref<128x128xf32, #tpu.memory_space<vmem>>, vector<128x128xf32>
    %cst_41 = arith.constant dense<0.000000e+00> : vector<32x128xf32>
    %91 = tpu.matmul %89, %90, %cst_41 {dimension_numbers = #tpu.dot_dimension_numbers<[1], [0], [0], [1], [0, 0, 1, 1], [], []>} : vector<32x128xf32>, vector<128x128xf32>, vector<32x128xf32> -> vector<32x128xf32>
    %c0_42 = arith.constant 0 : index
    %c0_43 = arith.constant 0 : index
    %92 = vector.load %arg9[%c0_42, %c0_43] : memref<1x128xf32, #tpu.memory_space<vmem>>, vector<1x128xf32>
    %93 = vector.broadcast %92 : vector<1x128xf32> to vector<32x128xf32>
    %94 = arith.addf %91, %93 : vector<32x128xf32>
    %95 = math.absf %94 : vector<32x128xf32>
    %cst_44 = arith.constant 0.707106769 : f32
    %96 = vector.broadcast %cst_44 : f32 to vector<32x128xf32>
    %97 = arith.mulf %95, %96 : vector<32x128xf32>
    %cst_45 = arith.constant 0.327591091 : f32
    %98 = vector.broadcast %cst_45 : f32 to vector<32x128xf32>
    %99 = arith.mulf %98, %97 : vector<32x128xf32>
    %cst_46 = arith.constant 1.000000e+00 : f32
    %100 = vector.broadcast %cst_46 : f32 to vector<32x128xf32>
    %101 = arith.addf %100, %99 : vector<32x128xf32>
    %102 = tpu.reciprocal %101 {approx = true} : vector<32x128xf32> -> vector<32x128xf32>
    %103 = arith.mulf %101, %102 : vector<32x128xf32>
    %cst_47 = arith.constant 2.000000e+00 : f32
    %104 = vector.broadcast %cst_47 : f32 to vector<32x128xf32>
    %105 = arith.subf %104, %103 : vector<32x128xf32>
    %106 = arith.mulf %102, %105 : vector<32x128xf32>
    %cst_48 = arith.constant 1.06140542 : f32
    %107 = vector.broadcast %cst_48 : f32 to vector<32x128xf32>
    %108 = arith.mulf %107, %106 : vector<32x128xf32>
    %cst_49 = arith.constant -1.45315206 : f32
    %109 = vector.broadcast %cst_49 : f32 to vector<32x128xf32>
    %110 = arith.addf %108, %109 : vector<32x128xf32>
    %111 = arith.mulf %110, %106 : vector<32x128xf32>
    %cst_50 = arith.constant 1.42141378 : f32
    %112 = vector.broadcast %cst_50 : f32 to vector<32x128xf32>
    %113 = arith.addf %111, %112 : vector<32x128xf32>
    %114 = arith.mulf %113, %106 : vector<32x128xf32>
    %cst_51 = arith.constant -0.284496725 : f32
    %115 = vector.broadcast %cst_51 : f32 to vector<32x128xf32>
    %116 = arith.addf %114, %115 : vector<32x128xf32>
    %117 = arith.mulf %116, %106 : vector<32x128xf32>
    %cst_52 = arith.constant 0.254829586 : f32
    %118 = vector.broadcast %cst_52 : f32 to vector<32x128xf32>
    %119 = arith.addf %117, %118 : vector<32x128xf32>
    %120 = arith.mulf %119, %106 : vector<32x128xf32>
    %cst_53 = arith.constant 5.000000e-01 : f32
    %121 = vector.broadcast %cst_53 : f32 to vector<32x128xf32>
    %122 = arith.mulf %121, %95 : vector<32x128xf32>
    %123 = arith.mulf %122, %120 : vector<32x128xf32>
    %cst_54 = arith.constant 0.000000e+00 : f32
    %124 = vector.broadcast %cst_54 : f32 to vector<32x128xf32>
    %125 = arith.subf %124, %97 : vector<32x128xf32>
    %126 = arith.mulf %125, %97 : vector<32x128xf32>
    %127 = math.exp %126 : vector<32x128xf32>
    %128 = arith.mulf %123, %127 : vector<32x128xf32>
    %cst_55 = arith.constant 0.000000e+00 : f32
    %129 = vector.broadcast %cst_55 : f32 to vector<32x128xf32>
    %130 = arith.maximumf %94, %129 : vector<32x128xf32>
    %131 = arith.subf %130, %128 : vector<32x128xf32>
    %c0_56 = arith.constant 0 : index
    %c0_57 = arith.constant 0 : index
    %132 = vector.load %arg10[%c0_56, %c0_57] : memref<128x16xf32, #tpu.memory_space<vmem>>, vector<128x16xf32>
    %cst_58 = arith.constant dense<0.000000e+00> : vector<32x16xf32>
    %133 = tpu.matmul %131, %132, %cst_58 {dimension_numbers = #tpu.dot_dimension_numbers<[1], [0], [0], [1], [0, 0, 1, 1], [], []>} : vector<32x128xf32>, vector<128x16xf32>, vector<32x16xf32> -> vector<32x16xf32>
    %c0_59 = arith.constant 0 : index
    %c0_60 = arith.constant 0 : index
    %134 = vector.load %arg11[%c0_59, %c0_60] : memref<1x16xf32, #tpu.memory_space<vmem>>, vector<1x16xf32>
    %135 = vector.broadcast %134 : vector<1x16xf32> to vector<32x16xf32>
    %136 = arith.addf %133, %135 : vector<32x16xf32>
    %c0_61 = arith.constant 0 : index
    %c0_62 = arith.constant 0 : index
    %137 = vector.load %arg12[%c0_61, %c0_62] : memref<32x16xf32, #tpu.memory_space<vmem>>, vector<32x16xf32>
    tpu.vector_store %arg12[%c0_61, %c0_62], %136 {strides = array<i32>} : memref<32x16xf32, #tpu.memory_space<vmem>>, vector<32x16xf32>,
    return
  }
  func.func @transform_0(%arg0: i32) -> (i32, i32) {
    %c0_i32 = arith.constant 0 : i32
    %c0_i32_0 = arith.constant 0 : i32
    return %arg0, %c0_i32 : i32, i32
  }
  func.func @transform_1(%arg0: i32) -> (i32, i32) {
    %c0_i32 = arith.constant 0 : i32
    %c0_i32_0 = arith.constant 0 : i32
    %c0_i32_1 = arith.constant 0 : i32
    return %c0_i32, %c0_i32_0 : i32, i32
  }
  func.func @transform_2(%arg0: i32) -> (i32, i32) {
    %c0_i32 = arith.constant 0 : i32
    %c0_i32_0 = arith.constant 0 : i32
    %c0_i32_1 = arith.constant 0 : i32
    return %c0_i32, %c0_i32_0 : i32, i32
  }
  func.func @transform_3(%arg0: i32) -> (i32, i32) {
    %c0_i32 = arith.constant 0 : i32
    %c0_i32_0 = arith.constant 0 : i32
    %c0_i32_1 = arith.constant 0 : i32
    return %c0_i32, %c0_i32_0 : i32, i32
  }
  func.func @transform_4(%arg0: i32) -> (i32, i32) {
    %c0_i32 = arith.constant 0 : i32
    %c0_i32_0 = arith.constant 0 : i32
    %c0_i32_1 = arith.constant 0 : i32
    return %c0_i32, %c0_i32_0 : i32, i32
  }
  func.func @transform_5(%arg0: i32) -> (i32, i32) {
    %c0_i32 = arith.constant 0 : i32
    %c0_i32_0 = arith.constant 0 : i32
    %c0_i32_1 = arith.constant 0 : i32
    return %c0_i32, %c0_i32_0 : i32, i32
  }
  func.func @transform_6(%arg0: i32) -> (i32, i32) {
    %c0_i32 = arith.constant 0 : i32
    %c0_i32_0 = arith.constant 0 : i32
    %c0_i32_1 = arith.constant 0 : i32
    return %c0_i32, %c0_i32_0 : i32, i32
  }
  func.func @transform_7(%arg0: i32) -> (i32, i32) {
    %c0_i32 = arith.constant 0 : i32
    %c0_i32_0 = arith.constant 0 : i32
    %c0_i32_1 = arith.constant 0 : i32
    return %c0_i32, %c0_i32_0 : i32, i32
  }
  func.func @transform_8(%arg0: i32) -> (i32, i32) {
    %c0_i32 = arith.constant 0 : i32
    %c0_i32_0 = arith.constant 0 : i32
    %c0_i32_1 = arith.constant 0 : i32
    return %c0_i32, %c0_i32_0 : i32, i32
  }
  func.func @transform_9(%arg0: i32) -> (i32, i32) {
    %c0_i32 = arith.constant 0 : i32
    %c0_i32_0 = arith.constant 0 : i32
    %c0_i32_1 = arith.constant 0 : i32
    return %c0_i32, %c0_i32_0 : i32, i32
  }
  func.func @transform_10(%arg0: i32) -> (i32, i32) {
    %c0_i32 = arith.constant 0 : i32
    %c0_i32_0 = arith.constant 0 : i32
    %c0_i32_1 = arith.constant 0 : i32
    return %c0_i32, %c0_i32_0 : i32, i32
  }
  func.func @transform_11(%arg0: i32) -> (i32, i32) {
    %c0_i32 = arith.constant 0 : i32
    %c0_i32_0 = arith.constant 0 : i32
    return %arg0, %c0_i32 : i32, i32
  }
}

</mosaic_0001>

<bundles_post_ra>
// kernel: tpu_custom_call.1
= control target key start
LH: loop header
LB: loop body
LE: loop exit
PB: predicated region body
PF: predicated region fallthrough
CT: control target
= control target key end

     0   :  { %16 = vsyncpa [#allocation3], 0  ;;  %s2306_s0 = inlined_call_operand.vmem [shape: f32[64,12], index: 0, kind: input, shape index: {}]   ;;  %s2307_s1 = inlined_call_operand.vmem [shape: f32[12,128], index: 1, kind: input, shape index: {}]   ;;  %s2308_s2 = inlined_call_operand.vmem [shape: f32[1,128], index: 2, kind: input, shape index: {}]   ;;  %s2309_s3 = inlined_call_operand.vmem [shape: f32[128,128], index: 3, kind: input, shape index: {}]   ;;  %s2310_s4 = inlined_call_operand.vmem [shape: f32[1,128], index: 4, kind: input, shape index: {}]   ;;  %s2311_s5 = inlined_call_operand.hbm [shape: f32[128,128], index: 5, kind: input, shape index: {}]   ;;  %s2312_s6 = inlined_call_operand.vmem [shape: f32[1,128], index: 6, kind: input, shape index: {}]   ;;  %s2313_s7 = inlined_call_operand.hbm [shape: f32[128,128], index: 7, kind: input, shape index: {}]   ;;  %s2314_s8 = inlined_call_operand.vmem [shape: f32[1,128], index: 8, kind: input, shape index: {}]   ;;  %s2315_s9 = inlined_call_operand.vmem [shape: f32[128,16], index: 9, kind: input, shape index: {}]   ;;  %s2316_s10 = inlined_call_operand.vmem [shape: f32[1,16], index: 10, kind: input, shape index: {}]   ;;  %s2317_s11 = inlined_call_operand.vmem [shape: f32[64,16], index: 11, kind: output, shape index: {}]  }
   0x1   :  { %17 = vsyncpa [#allocation5], 0  ;;  %s1986_s17 = smov 0  }
   0x2 LB: > { %s1362_s18 = sadd.s32 4294967295, %s1919_s17   ;;  %p1364_p0 = scmp.ge.s32.totalorder %s1919_s17, 1  ;;  %s1919_s17 = sphi %s1986_s17, %s23_s17  }
   0x3   : > { %p290_p1 = scmp.lt.s32.totalorder %s1919_s17, 3  ;;  %s1921_s19 = smov [#allocation2]  }
   0x4   : > { %s314_s20 = sshll.u32 %s1921_s19, 4  ;;  %p2000_p3 = scmp.eq.s32.totalorder %s1362_s18, 0  ;;  %s315_s20 = int_to_ptr.vmem [resolvable:$true] %s314_s20 }
   0x5   : > { %p1994_p2 = pnand %p1364_p0, %p290_p1  ;;  %s1922_s23 = smov [#allocation4]  }
   0x6   : > { %s2322_s22 = scalar_select %p2000_p3, 1, 0 }
   0x7   : > { %s2321_s21 = scalar_select %p1994_p2, 1, 0 }
   0x8   : > { %p1777_p4 = pneg %p1994_p2  ;;  %s330_s24 = sshll.u32 %s1922_s23, 4  ;;  %s2012_s24 = int_to_ptr.vmem [resolvable:$true] %s330_s24 }
   0x9   : > { %s1849_s28 = scalar_lea.hbm %s2311_s5, 2048 }
   0xa   : > { %p2008_p5 = pnand %p2000_p3, %p1777_p4  ;;  %p1850_p6 = scmp.ne.s32.totalorder %s2311_s5, %s1849_s28 }
   0xb   : > { %p1856_p10 = scmp.lt.u32.totalorder %s1849_s28, %s2311_s5 }
   0xc   : > { %p1851_p7 = pneg %p2008_p5 }
   0xe   : > { %p1852_p8 = pnand %p1851_p7, %p1850_p6 }
  0x10   : > { %p1853_p9 = pneg %p1852_p8 }
  0x12   : > { %p1858_p11 = pnand %p1856_p10, %p1853_p9 }
  0x14   : > { %1861 = shalt.err (!%p1858_p11)
}
  0x15   : > { %s1862_s14 = scalar_lea.vmem %s315_s20, 2048  ;;  %p1870_p1 = scmp.lt.s32.totalorder %s315_s20, %s315_s20 }
  0x16   : > { %p1863_p12 = scmp.ne.s32.totalorder %s315_s20, %s1862_s14  ;;  %p1871_p4 = scmp.lt.s32.totalorder %s1862_s14, %s1862_s14 }
  0x18   : > { %p1865_p13 = pnand %p1863_p12, %p1851_p7  ;;  %p1872_p3 = por %p1871_p4, %p1870_p1 }
  0x1a   : > { %p1866_p0 = pneg %p1865_p13 }
  0x1c   : > { %p1873_p2 = pnand %p1872_p3, %p1866_p0 }
  0x1e   : > { %1876 = shalt.err (!%p1873_p2)
}
  0x1f   : > { %s1923_s15 = smov 128   ;;  %s1924_s16 = smov 8  }
  0x20   : > { %1780 = dma.hbm_to_vmem [thread:$0]  (!%p2008_p5), %s2311_s5, 2048, %s315_s20, [#allocation3], %s1923_s15, %s1923_s15, %s1924_s16  }
  0x21   : > { %s1877_s28 = scalar_lea.hbm %s2313_s7, 2048 }
  0x22   : > { %p1878_p6 = scmp.ne.s32.totalorder %s2313_s7, %s1877_s28  ;;  %p1884_p8 = scmp.lt.u32.totalorder %s1877_s28, %s2313_s7 }
  0x24   : > { %p1880_p2 = pnand %p1878_p6, %p1851_p7 }
  0x26   : > { %p1881_p3 = pneg %p1880_p2 }
  0x28   : > { %p1886_p9 = pnand %p1884_p8, %p1881_p3 }
  0x2a   : > { %1889 = shalt.err (!%p1886_p9)
}
  0x2b   : > { %s1890_s20 = scalar_lea.vmem %s2012_s24, 2048  ;;  %p1898_p13 = scmp.lt.s32.totalorder %s2012_s24, %s2012_s24 }
  0x2c   : > { %p1891_p10 = scmp.ne.s32.totalorder %s2012_s24, %s1890_s20  ;;  %p1899_p0 = scmp.lt.s32.totalorder %s1890_s20, %s1890_s20 }
  0x2e   : > { %p1893_p11 = pnand %p1891_p10, %p1851_p7  ;;  %p1900_p1 = por %p1899_p0, %p1898_p13 }
  0x30   : > { %p1894_p12 = pneg %p1893_p11 }
  0x32   : > { %p1901_p4 = pnand %p1900_p1, %p1894_p12 }
  0x34   : > { %1904 = shalt.err (!%p1901_p4)
}
  0x35   : > { %1783 = dma.hbm_to_vmem [thread:$0]  (!%p2008_p5), %s2313_s7, 2048, %s2012_s24, [#allocation5], %s1923_s15, %s1923_s15, %s1924_s16  }
  0x36   : > { %p2324_p6 = scmp.ne.s32.totalorder %s2321_s21, 0 }
  0x37   : > { %p2325_p2 = scmp.ne.s32.totalorder (!%p2324_p6), %s2322_s22, 0 }
  0x38   : > { %364 = sbr.rel (%p2324_p6) target bundleno = 1305 (0x519), region = 64 }
  0x3f   : > { %1910 = dma.done.wait (%p2325_p2), [#allocation3], 2048  }
  0x40   : > { %1912 = vsyncadd (%p2325_p2), [#allocation3], 4294965248 }
  0x41   : > { %1914 = dma.done.wait (%p2325_p2), [#allocation5], 2048  }
  0x42   : > { %1916 = vsyncadd (%p2325_p2), [#allocation5], 4294965248  ;;  %s1371_s25 = sshll.u32 %s1362_s18, 2  ;;  %vm446_vm0 = vcmask 1043456   ;;  %vm433_vm1 = vcmask 97280   ;;  %vm1925_vm2 = vmmov 1  }
  0x43   : > { %p409_p7 = scmp.lt.s32.totalorder %s1371_s25, 7  ;;  %vm1636_vm3 = vmpackc.low %vm446_vm0, %vm1925_vm2  ;;  %v424_v0 = vld [vmem:[%s2307_s1] sm:$0xff]  ;;  %v425_v1 = vld [vmem:[%s2307_s1 + $0x8] sm:$0xf]  ;;  %vm1279_vm4 = vcmask 130048  }
  0x44   : > { %v1635_v3 = vpack.c.bf16 %v425_v1, %v424_v0  ;;  %v639_v7 = vld [vmem:[%s2309_s3] sm:$0xff]  ;;  %v640_v8 = vld [vmem:[%s2309_s3 + $0x8] sm:$0xff]  ;;  %v641_v10 = vld [vmem:[%s2309_s3 + $0x10] sm:$0xff] }
  0x45   : > { %s2327_s25 = smov (!%p409_p7, %s1371_s25), 7  ;;  %v1641_v9 = vpack.c.bf16 %v640_v8, %v639_v7  ;;  %v642_v11 = vld [vmem:[%s2309_s3 + $0x18] sm:$0xff]  ;;  %v643_v13 = vld [vmem:[%s2309_s3 + $0x20] sm:$0xff]  ;;  %v644_v14 = vld [vmem:[%s2309_s3 + $0x28] sm:$0xff] }
  0x46   : > { %s1372_s21 = sshll.u32 %s2327_s25, 3  ;;  %1637 = vmatprep.subr.msk.bf16.mxu0 %vm1636_vm3, %v1635_v3  ;;  %v1645_v12 = vpack.c.bf16 %v642_v11, %v641_v10  ;;  %v1649_v15 = vpack.c.bf16 %v644_v14, %v643_v13  ;;  %v645_v16 = vld [vmem:[%s2309_s3 + $0x30] sm:$0xff]  ;;  %v646_v17 = vld [vmem:[%s2309_s3 + $0x38] sm:$0xff]  ;;  %v647_v19 = vld [vmem:[%s2309_s3 + $0x40] sm:$0xff] }
  0x47   : > { %s412_s16 = scalar_lea.vmem %s2306_s0, %s1372_s21  ;;  %1640 = vmatpush3.bf16.msk.msra.mxu0 %vm1636_vm3, %v1635_v3  ;;  %1642 = vmatprep.subr.bf16.mxu1 %v1641_v9  ;;  %v1653_v18 = vpack.c.bf16 %v646_v17, %v645_v16  ;;  %v648_v20 = vld [vmem:[%s2309_s3 + $0x48] sm:$0xff]  ;;  %v649_v22 = vld [vmem:[%s2309_s3 + $0x50] sm:$0xff]  ;;  %v650_v23 = vld [vmem:[%s2309_s3 + $0x58] sm:$0xff]  ;;  %s418_s22 = scalar_lea.vmem %s2317_s11, %s1372_s21 }
  0x48   : > { %v420_v2 = vld [vmem:[%s412_s16] sm:$0xff]  ;;  %v421_v4 = vld [vmem:[%s412_s16 + $0x8] sm:$0xff]  ;;  %v422_v5 = vld [vmem:[%s412_s16 + $0x10] sm:$0xff]  ;;  %1644 = vmatpush3.bf16.msra.mxu1 %v1641_v9  ;;  %v1657_v21 = vpack.c.bf16 %v648_v20, %v647_v19  ;;  %v1661_v24 = vpack.c.bf16 %v650_v23, %v649_v22 }
  0x49   : > { %1477 = vmatprep.mubr.msk.f32.mxu0 %vm433_vm1, %v420_v2  ;;  %v423_v6 = vld [vmem:[%s412_s16 + $0x18] sm:$0xff]  ;;  %1646 = vmatprep.subr.bf16.mxu1 %v1645_v12  ;;  %v651_v25 = vld [vmem:[%s2309_s3 + $0x60] sm:$0xff]  ;;  %v652_v26 = vld [vmem:[%s2309_s3 + $0x68] sm:$0xff] }
  0x4a   : > { %1478 = vmatmul.mubr.msk.f32.vlgmr.msra.gmra.mrb[0].mxu0 %vm433_vm1, %v421_v4  ;;  %v1665_v27 = vpack.c.bf16 %v652_v26, %v651_v25  ;;  %v653_v28 = vld [vmem:[%s2309_s3 + $0x70] sm:$0xff]  ;;  %v654_v29 = vld [vmem:[%s2309_s3 + $0x78] sm:$0xff]  ;;  %v747_v31 = vld [vmem:[#allocation2] sm:$0xff] }
  0x4b   : > { %1480 = vmatprep.mubr.msk.f32.mxu0 %vm433_vm1, %v422_v5  ;;  %v1669_v30 = vpack.c.bf16 %v654_v29, %v653_v28  ;;  %v748_v32 = vld [vmem:[#allocation2 + $0x8] sm:$0xff]  ;;  %v749_v33 = vld [vmem:[#allocation2 + $0x10] sm:$0xff]  ;;  %v750_v35 = vld [vmem:[#allocation2 + $0x18] sm:$0xff] }
  0x4c   : > { %1648 = vmatpush3.bf16.msra.mxu1 %v1645_v12  ;;  %v1673_v34 = vpack.c.bf16 %v748_v32, %v747_v31  ;;  %v1677_v36 = vpack.c.bf16 %v750_v35, %v749_v33  ;;  %v751_v37 = vld [vmem:[#allocation2 + $0x20] sm:$0xff]  ;;  %v752_v38 = vld [vmem:[#allocation2 + $0x28] sm:$0xff]  ;;  %v753_v40 = vld [vmem:[#allocation2 + $0x30] sm:$0xff] }
  0x4d   : > { %1650 = vmatprep.subr.bf16.mxu1 %v1649_v15  ;;  %v1681_v39 = vpack.c.bf16 %v752_v38, %v751_v37  ;;  %v754_v41 = vld [vmem:[#allocation2 + $0x38] sm:$0xff]  ;;  %v755_v43 = vld [vmem:[#allocation2 + $0x40] sm:$0xff]  ;;  %v756_v44 = vld [vmem:[#allocation2 + $0x48] sm:$0xff] }
  0x4e   : > { %1481 = vmatmul.mubr.msk.f32.gmra.mrb[2].mxu0 %vm433_vm1, %v423_v6  ;;  %1674 = vmatprep.subr.bf16.mxu0 %v1673_v34  ;;  %v1685_v42 = vpack.c.bf16 %v754_v41, %v753_v40  ;;  %v1689_v45 = vpack.c.bf16 %v756_v44, %v755_v43  ;;  %v757_v46 = vld [vmem:[#allocation2 + $0x50] sm:$0xff]  ;;  %v758_v47 = vld [vmem:[#allocation2 + $0x58] sm:$0xff]  ;;  %v759_v49 = vld [vmem:[#allocation2 + $0x60] sm:$0xff] }
  0x4f   : > { %1676 = vmatpush3.bf16.msra.mxu0 %v1673_v34  ;;  %v1693_v48 = vpack.c.bf16 %v758_v47, %v757_v46  ;;  %v760_v50 = vld [vmem:[#allocation2 + $0x68] sm:$0xff]  ;;  %v1375_v52 = vld [vmem:[%s2308_s2] ss:$0 sm:$0xff] }
  0x50   : > { %1652 = vmatpush3.bf16.msra.mxu1 %v1649_v15  ;;  %1678 = vmatprep.subr.bf16.mxu0 %v1677_v36  ;;  %v1697_v51 = vpack.c.bf16 %v760_v50, %v759_v49 }
  0x51   : > { %1654 = vmatprep.subr.bf16.mxu1 %v1653_v18 }
  0x53   : > { %1680 = vmatpush3.bf16.msra.mxu0 %v1677_v36 }
  0x54   : > { %1656 = vmatpush3.bf16.msra.mxu1 %v1653_v18  ;;  %1682 = vmatprep.subr.bf16.mxu0 %v1681_v39 }
  0x55   : > { %1658 = vmatprep.subr.bf16.mxu1 %v1657_v21 }
  0x57   : > { %1684 = vmatpush3.bf16.msra.mxu0 %v1681_v39 }
  0x58   : > { %1660 = vmatpush3.bf16.msra.mxu1 %v1657_v21  ;;  %1686 = vmatprep.subr.bf16.mxu0 %v1685_v42 }
  0x59   : > { %1662 = vmatprep.subr.bf16.mxu1 %v1661_v24 }
  0x5b   : > { %1688 = vmatpush3.bf16.msra.mxu0 %v1685_v42 }
  0x5c   : > { %1664 = vmatpush3.bf16.msra.mxu1 %v1661_v24  ;;  %1690 = vmatprep.subr.bf16.mxu0 %v1689_v45 }
  0x5d   : > { %1666 = vmatprep.subr.bf16.mxu1 %v1665_v27 }
  0x5f   : > { %1692 = vmatpush3.bf16.msra.mxu0 %v1689_v45 }
  0x60   : > { %1668 = vmatpush3.bf16.msra.mxu1 %v1665_v27  ;;  %1694 = vmatprep.subr.bf16.mxu0 %v1693_v48 }
  0x61   : > { %1670 = vmatprep.subr.bf16.mxu1 %v1669_v30 }
  0x63   : > { %1696 = vmatpush3.bf16.msra.mxu0 %v1693_v48 }
  0x64   : > { %1672 = vmatpush3.bf16.msra.mxu1 %v1669_v30  ;;  %1698 = vmatprep.subr.bf16.mxu0 %v1697_v51 }
  0x67   : > { %1700 = vmatpush3.bf16.msra.mxu0 %v1697_v51 }
 0x11d   : > { %v1479_v53 = vpop.f32.mrb[0].mxu0 }
 0x11e   : > { %v2142_v54 = vadd.f32 %v1479_v53, %v1375_v52  ;;  %v516_v55 = vpop.f32.mrb[1].mxu0 }
 0x11f   : > { %v2144_v56 = vadd.f32 %v1375_v52, %v516_v55 }
 0x120   : > { %v536_v57 = vand.u32 2147483647, %v2142_v54 }
 0x121   : > { %v535_v58 = vand.u32 2147483647, %v2144_v56  ;;  %v1482_v59 = vpop.f32.mrb[2].mxu0 }
 0x122   : > { %v540_v60 = vmul.f32 0.70710677, %v536_v57  ;;  %v2150_v61 = vadd.f32 %v1482_v59, %v1375_v52  ;;  %v526_v62 = vpop.f32.mrb[3].mxu0 }
 0x123   : > { %v539_v63 = vmul.f32 0.70710677, %v535_v58  ;;  %v2154_v0 = vadd.f32 %v1375_v52, %v526_v62 }
 0x124   : > { %v544_v1 = vmul.f32 0.3275911, %v540_v60  ;;  %v538_v2 = vand.u32 2147483647, %v2150_v61  ;;  %v612_v19 = vsub.f32 0.0, %v540_v60 }
 0x125   : > { %v543_v3 = vmul.f32 0.3275911, %v539_v63  ;;  %v537_v4 = vand.u32 2147483647, %v2154_v0  ;;  %v611_v23 = vsub.f32 0.0, %v539_v63 }
 0x126   : > { %v548_v5 = vadd.f32 1.0, %v544_v1  ;;  %v542_v6 = vmul.f32 0.70710677, %v538_v2  ;;  %v616_v29 = vmul.f32 %v612_v19, %v540_v60 }
 0x127   : > { %v547_v7 = vadd.f32 1.0, %v543_v3  ;;  %v541_v8 = vmul.f32 0.70710677, %v537_v4  ;;  %v615_v34 = vmul.f32 %v611_v23, %v539_v63 }
 0x128   : > { %1801 = vrcp.f32 %v548_v5  ;;  %v546_v9 = vmul.f32 0.3275911, %v542_v6  ;;  %v614_v30 = vsub.f32 0.0, %v542_v6  ;;  %v621_v41 = vmul.f32 1.442695, %v616_v29 }
 0x129   : > { %1803 = vrcp.f32 %v547_v7  ;;  %v545_v10 = vmul.f32 0.3275911, %v541_v8  ;;  %v613_v36 = vsub.f32 0.0, %v541_v8  ;;  %v619_v46 = vmul.f32 1.442695, %v615_v34 }
 0x12a   : > { %v550_v11 = vadd.f32 1.0, %v546_v9  ;;  %v618_v42 = vmul.f32 %v614_v30, %v542_v6 }
 0x12b   : > { %v549_v12 = vadd.f32 1.0, %v545_v10  ;;  %v617_v48 = vmul.f32 %v613_v36, %v541_v8 }
 0x12c   : > { %1805 = vrcp.f32 %v550_v11  ;;  %v625_v53 = vmul.f32 1.442695, %v618_v42  ;;  %v1381_v42 = vld [vmem:[%s2310_s4] ss:$0 sm:$0xff] }
 0x12d   : > { %1807 = vrcp.f32 %v549_v12  ;;  %v623_v63 = vmul.f32 1.442695, %v617_v48 }
 0x12e   : > { %1809 = vpow2.f32 %v621_v41 }
 0x12f   : > { %1811 = vpow2.f32 %v619_v46 }
 0x130   : > { %1813 = vpow2.f32 %v625_v53  ;;  %v962_v53 = vld [vmem:[#allocation4 + $0x18] sm:$0xff] }
 0x131   : > { %1815 = vpow2.f32 %v623_v63  ;;  %v965_v63 = vld [vmem:[#allocation4 + $0x30] sm:$0xff] }
 0x132   : > { %v1802_v13 = vpop.eup %1801 }
 0x133   : > { %v1804_v14 = vpop.eup %1803  ;;  %v556_v15 = vmul.f32 %v1802_v13, %v548_v5 }
 0x134   : > { %v555_v16 = vmul.f32 %v1804_v14, %v547_v7 }
 0x135   : > { %v560_v17 = vsub.f32 2.0, %v556_v15 }
 0x136   : > { %v1806_v18 = vpop.eup %1805  ;;  %v559_v20 = vsub.f32 2.0, %v555_v16  ;;  %v603_v16 = vmul.f32 0.5, %v535_v58  ;;  %v631_v58 = vmax.f32 %v2144_v56, 0.0  ;;  %v761_v56 = vld [vmem:[#allocation2 + $0x70] sm:$0xff] }
 0x137   : > { %v1808_v21 = vpop.eup %1807  ;;  %v564_v22 = vmul.f32 %v1802_v13, %v560_v17  ;;  %v558_v24 = vmul.f32 %v1806_v18, %v550_v11 }
 0x138   : > { %v563_v25 = vmul.f32 %v1804_v14, %v559_v20  ;;  %v557_v26 = vmul.f32 %v1808_v21, %v549_v12  ;;  %v604_v14 = vmul.f32 0.5, %v536_v57  ;;  %v605_v57 = vmul.f32 0.5, %v537_v4 }
 0x139   : > { %v568_v27 = vmul.f32 1.0614054, %v564_v22  ;;  %v562_v28 = vsub.f32 2.0, %v558_v24 }
 0x13a   : > { %v561_v31 = vsub.f32 2.0, %v557_v26  ;;  %v567_v32 = vmul.f32 1.0614054, %v563_v25 }
 0x13b   : > { %v572_v33 = vadd.f32 -1.4531521, %v568_v27  ;;  %v566_v35 = vmul.f32 %v1806_v18, %v562_v28  ;;  %v606_v28 = vmul.f32 0.5, %v538_v2 }
 0x13c   : > { %v565_v37 = vmul.f32 %v1808_v21, %v561_v31  ;;  %v571_v38 = vadd.f32 -1.4531521, %v567_v32  ;;  %v1810_v21 = vpop.eup %1809 }
 0x13d   : > { %v576_v39 = vmul.f32 %v572_v33, %v564_v22  ;;  %v570_v40 = vmul.f32 1.0614054, %v566_v35  ;;  %v1812_v26 = vpop.eup %1811 }
 0x13e   : > { %v569_v43 = vmul.f32 1.0614054, %v565_v37  ;;  %v575_v44 = vmul.f32 %v571_v38, %v563_v25  ;;  %v1814_v32 = vpop.eup %1813 }
 0x13f   : > { %v580_v45 = vadd.f32 1.4214138, %v576_v39  ;;  %v574_v47 = vadd.f32 -1.4531521, %v570_v40  ;;  %v1816_v36 = vpop.eup %1815  ;;  %v633_v39 = vmax.f32 %v2154_v0, 0.0 }
 0x140   : > { %v573_v49 = vadd.f32 -1.4531521, %v569_v43  ;;  %v579_v50 = vadd.f32 1.4214138, %v575_v44 }
 0x141   : > { %v584_v51 = vmul.f32 %v580_v45, %v564_v22  ;;  %v578_v52 = vmul.f32 %v574_v47, %v566_v35 }
 0x142   : > { %v577_v55 = vmul.f32 %v573_v49, %v565_v37  ;;  %v583_v59 = vmul.f32 %v579_v50, %v563_v25  ;;  %v959_v49 = vld [vmem:[#allocation4] sm:$0xff]  ;;  %v960_v50 = vld [vmem:[#allocation4 + $0x8] sm:$0xff] }
 0x143   : > { %v588_v60 = vadd.f32 -0.28449672, %v584_v51  ;;  %v582_v62 = vadd.f32 1.4214138, %v578_v52  ;;  %v1705_v51 = vpack.c.bf16 %v960_v50, %v959_v49  ;;  %v961_v52 = vld [vmem:[#allocation4 + $0x10] sm:$0xff] }
 0x144   : > { %v581_v1 = vadd.f32 1.4214138, %v577_v55  ;;  %v587_v3 = vadd.f32 -0.28449672, %v583_v59  ;;  %v1709_v55 = vpack.c.bf16 %v962_v53, %v961_v52  ;;  %v963_v59 = vld [vmem:[#allocation4 + $0x20] sm:$0xff] }
 0x145   : > { %v592_v5 = vmul.f32 %v588_v60, %v564_v22  ;;  %v586_v6 = vmul.f32 %v582_v62, %v566_v35  ;;  %1706 = vmatprep.subr.bf16.mxu1 %v1705_v51  ;;  %v964_v60 = vld [vmem:[#allocation4 + $0x28] sm:$0xff] }
 0x146   : > { %v585_v7 = vmul.f32 %v581_v1, %v565_v37  ;;  %v591_v9 = vmul.f32 %v587_v3, %v563_v25  ;;  %v1713_v62 = vpack.c.bf16 %v964_v60, %v963_v59  ;;  %v966_v1 = vld [vmem:[#allocation4 + $0x38] sm:$0xff] }
 0x147   : > { %v596_v8 = vadd.f32 0.2548296, %v592_v5  ;;  %v590_v10 = vadd.f32 -0.28449672, %v586_v6  ;;  %v1717_v3 = vpack.c.bf16 %v966_v1, %v965_v63  ;;  %v967_v5 = vld [vmem:[#allocation4 + $0x40] sm:$0xff]  ;;  %v968_v6 = vld [vmem:[#allocation4 + $0x48] sm:$0xff] }
 0x148   : > { %v589_v11 = vadd.f32 -0.28449672, %v585_v7  ;;  %v595_v12 = vadd.f32 0.2548296, %v591_v9  ;;  %v1721_v7 = vpack.c.bf16 %v968_v6, %v967_v5  ;;  %v969_v9 = vld [vmem:[#allocation4 + $0x50] sm:$0xff] }
 0x149   : > { %v600_v13 = vmul.f32 %v596_v8, %v564_v22  ;;  %v594_v15 = vmul.f32 %v590_v10, %v566_v35  ;;  %v970_v8 = vld [vmem:[#allocation4 + $0x58] sm:$0xff] }
 0x14a   : > { %v593_v17 = vmul.f32 %v589_v11, %v565_v37  ;;  %v599_v18 = vmul.f32 %v595_v12, %v563_v25  ;;  %v632_v25 = vmax.f32 %v2142_v54, 0.0  ;;  %v762_v54 = vld [vmem:[#allocation2 + $0x78] sm:$0xff]  ;;  %v1725_v10 = vpack.c.bf16 %v970_v8, %v969_v9  ;;  %v971_v11 = vld [vmem:[#allocation4 + $0x60] sm:$0xff]  ;;  %v972_v12 = vld [vmem:[#allocation4 + $0x68] sm:$0xff] }
 0x14b   : > { %v608_v19 = vmul.f32 %v604_v14, %v600_v13  ;;  %v598_v20 = vadd.f32 0.2548296, %v594_v15  ;;  %v1701_v41 = vpack.c.bf16 %v762_v54, %v761_v56  ;;  %v1729_v13 = vpack.c.bf16 %v972_v12, %v971_v11  ;;  %v973_v14 = vld [vmem:[#allocation4 + $0x70] sm:$0xff]  ;;  %v974_v15 = vld [vmem:[#allocation4 + $0x78] sm:$0xff] }
 0x14c   : > { %v597_v23 = vadd.f32 0.2548296, %v593_v17  ;;  %v607_v24 = vmul.f32 %v603_v16, %v599_v18  ;;  %v1733_v16 = vpack.c.bf16 %v974_v15, %v973_v14  ;;  %v1382_v17 = vld [vmem:[%s2312_s6] ss:$0 sm:$0xff] }
 0x14d   : > { %v602_v27 = vmul.f32 %v598_v20, %v566_v35  ;;  %v628_v22 = vmul.f32 %v1810_v21, %v608_v19  ;;  %1702 = vmatprep.subr.bf16.mxu0 %v1701_v41 }
 0x14e   : > { %v601_v29 = vmul.f32 %v597_v23, %v565_v37  ;;  %v627_v30 = vmul.f32 %v1812_v26, %v607_v24  ;;  %v634_v37 = vmax.f32 %v2150_v61, 0.0  ;;  %1704 = vmatpush3.bf16.msra.mxu0 %v1701_v41 }
 0x14f   : > { %v610_v31 = vmul.f32 %v606_v28, %v602_v27  ;;  %v636_v38 = vsub.f32 %v632_v25, %v628_v22 }
 0x150   : > { %v609_v33 = vmul.f32 %v605_v57, %v601_v29  ;;  %v635_v34 = vsub.f32 %v631_v58, %v627_v30 }
 0x151   : > { %v630_v35 = vmul.f32 %v1814_v32, %v610_v31 }
 0x152   : > { %1515 = vmatprep.mubr.f32.mxu1 %v635_v34  ;;  %v629_v2 = vmul.f32 %v1816_v36, %v609_v33 }
 0x153   : > { %1516 = vmatmul.mubr.f32.vlgmr.msra.gmra.mrb[0].mxu1 %v636_v38  ;;  %v638_v40 = vsub.f32 %v634_v37, %v630_v35 }
 0x154   : > { %v637_v4 = vsub.f32 %v633_v39, %v629_v2  ;;  %1708 = vmatpush3.bf16.msra.mxu1 %v1705_v51 }
 0x155   : > { %1710 = vmatprep.subr.bf16.mxu1 %v1709_v55 }
 0x156   : > { %1518 = vmatprep.mubr.f32.mxu1 %v637_v4 }
 0x157   : > { %1519 = vmatmul.mubr.f32.gmra.mrb[2].mxu1 %v638_v40 }
 0x158   : > { %1712 = vmatpush3.bf16.msra.mxu1 %v1709_v55 }
 0x159   : > { %1714 = vmatprep.subr.bf16.mxu1 %v1713_v62 }
 0x15c   : > { %1716 = vmatpush3.bf16.msra.mxu1 %v1713_v62 }
 0x15d   : > { %1718 = vmatprep.subr.bf16.mxu1 %v1717_v3 }
 0x160   : > { %1720 = vmatpush3.bf16.msra.mxu1 %v1717_v3 }
 0x161   : > { %1722 = vmatprep.subr.bf16.mxu1 %v1721_v7 }
 0x164   : > { %1724 = vmatpush3.bf16.msra.mxu1 %v1721_v7 }
 0x165   : > { %1726 = vmatprep.subr.bf16.mxu1 %v1725_v10 }
 0x168   : > { %1728 = vmatpush3.bf16.msra.mxu1 %v1725_v10 }
 0x169   : > { %1730 = vmatprep.subr.bf16.mxu1 %v1729_v13 }
 0x16c   : > { %1732 = vmatpush3.bf16.msra.mxu1 %v1729_v13 }
 0x16d   : > { %1734 = vmatprep.subr.bf16.mxu1 %v1733_v16 }
 0x170   : > { %1736 = vmatpush3.bf16.msra.mxu1 %v1733_v16 }
 0x226   : > { %v1517_v43 = vpop.f32.mrb[0].mxu1 }
 0x227   : > { %v728_v0 = vpop.f32.mrb[1].mxu1  ;;  %v734_v45 = vadd.f32 %v1517_v43, %v1381_v42 }
 0x228   : > { %v729_v44 = vadd.f32 %v1381_v42, %v728_v0 }
 0x22a   : > { %v1520_v46 = vpop.f32.mrb[2].mxu1  ;;  %1553 = vmatprep.mubr.f32.mxu0 %v729_v44 }
 0x22b   : > { %v738_v61 = vpop.f32.mrb[3].mxu1  ;;  %1554 = vmatmul.mubr.f32.vlgmr.msra.gmra.mrb[4].mxu0 %v734_v45  ;;  %v744_v48 = vadd.f32 %v1520_v46, %v1381_v42 }
 0x22c   : > { %v739_v47 = vadd.f32 %v1381_v42, %v738_v61 }
 0x22e   : > { %1556 = vmatprep.mubr.f32.mxu0 %v739_v47 }
 0x22f   : > { %1557 = vmatmul.mubr.f32.gmra.mrb[6].mxu0 %v744_v48 }
 0x2fe   : > { %v1555_v18 = vpop.f32.mrb[4].mxu0 }
 0x2ff   : > { %v2180_v19 = vadd.f32 %v1555_v18, %v1382_v17  ;;  %v836_v20 = vpop.f32.mrb[5].mxu0 }
 0x300   : > { %v2182_v21 = vadd.f32 %v1382_v17, %v836_v20 }
 0x301   : > { %v856_v23 = vand.u32 2147483647, %v2180_v19 }
 0x302   : > { %v855_v24 = vand.u32 2147483647, %v2182_v21  ;;  %v1558_v26 = vpop.f32.mrb[6].mxu0 }
 0x303   : > { %v860_v27 = vmul.f32 0.70710677, %v856_v23  ;;  %v2188_v28 = vadd.f32 %v1558_v26, %v1382_v17  ;;  %v846_v22 = vpop.f32.mrb[7].mxu0 }
 0x304   : > { %v859_v29 = vmul.f32 0.70710677, %v855_v24  ;;  %v2192_v57 = vadd.f32 %v1382_v17, %v846_v22 }
 0x305   : > { %v864_v30 = vmul.f32 0.3275911, %v860_v27  ;;  %v858_v58 = vand.u32 2147483647, %v2188_v28  ;;  %v932_v42 = vsub.f32 0.0, %v860_v27 }
 0x306   : > { %v863_v25 = vmul.f32 0.3275911, %v859_v29  ;;  %v857_v31 = vand.u32 2147483647, %v2192_v57  ;;  %v931_v45 = vsub.f32 0.0, %v859_v29 }
 0x307   : > { %v868_v32 = vadd.f32 1.0, %v864_v30  ;;  %v862_v33 = vmul.f32 0.70710677, %v858_v58  ;;  %v936_v50 = vmul.f32 %v932_v42, %v860_v27 }
 0x308   : > { %v867_v34 = vadd.f32 1.0, %v863_v25  ;;  %v861_v36 = vmul.f32 0.70710677, %v857_v31  ;;  %v935_v59 = vmul.f32 %v931_v45, %v859_v29 }
 0x309   : > { %1817 = vrcp.f32 %v868_v32  ;;  %v866_v38 = vmul.f32 0.3275911, %v862_v33  ;;  %v934_v52 = vsub.f32 0.0, %v862_v33  ;;  %v941_v6 = vmul.f32 1.442695, %v936_v50 }
 0x30a   : > { %1819 = vrcp.f32 %v867_v34  ;;  %v865_v35 = vmul.f32 0.3275911, %v861_v36  ;;  %v933_v62 = vsub.f32 0.0, %v861_v36  ;;  %v939_v11 = vmul.f32 1.442695, %v935_v59 }
 0x30b   : > { %v870_v39 = vadd.f32 1.0, %v866_v38  ;;  %v938_v9 = vmul.f32 %v934_v52, %v862_v33  ;;  %v951_v50 = vmax.f32 %v2182_v21, 0.0  ;;  %v954_v21 = vmax.f32 %v2188_v28, 0.0  ;;  %v1173_v28 = vld [vmem:[%s2315_s9 + $0x10] sm:$0xff] }
 0x30c   : > { %v869_v2 = vadd.f32 1.0, %v865_v35  ;;  %v937_v13 = vmul.f32 %v933_v62, %v861_v36 }
 0x30d   : > { %1821 = vrcp.f32 %v870_v39  ;;  %v945_v20 = vmul.f32 1.442695, %v938_v9  ;;  %v1175_v9 = vld [vmem:[%s2315_s9 + $0x20] sm:$0xff] }
 0x30e   : > { %1823 = vrcp.f32 %v869_v2  ;;  %v943_v29 = vmul.f32 1.442695, %v937_v13 }
 0x30f   : > { %1825 = vpow2.f32 %v941_v6 }
 0x310   : > { %1827 = vpow2.f32 %v939_v11  ;;  %v1177_v11 = vld [vmem:[%s2315_s9 + $0x30] sm:$0xff] }
 0x311   : > { %1829 = vpow2.f32 %v945_v20 }
 0x312   : > { %1831 = vpow2.f32 %v943_v29  ;;  %v1185_v29 = vld [vmem:[%s2315_s9 + $0x70] sm:$0xff] }
 0x313   : > { %v1818_v37 = vpop.eup %1817 }
 0x314   : > { %v1820_v4 = vpop.eup %1819  ;;  %v876_v40 = vmul.f32 %v1818_v37, %v868_v32 }
 0x315   : > { %v875_v56 = vmul.f32 %v1820_v4, %v867_v34 }
 0x316   : > { %v880_v54 = vsub.f32 2.0, %v876_v40 }
 0x317   : > { %v1822_v41 = vpop.eup %1821  ;;  %v879_v43 = vsub.f32 2.0, %v875_v56 }
 0x318   : > { %v1824_v0 = vpop.eup %1823  ;;  %v884_v44 = vmul.f32 %v1818_v37, %v880_v54  ;;  %v878_v46 = vmul.f32 %v1822_v41, %v870_v39  ;;  %v923_v54 = vmul.f32 0.5, %v855_v24  ;;  %v952_v24 = vmax.f32 %v2180_v19, 0.0  ;;  %v1171_v19 = vld [vmem:[%s2315_s9] sm:$0xff] }
 0x319   : > { %v883_v61 = vmul.f32 %v1820_v4, %v879_v43  ;;  %v877_v47 = vmul.f32 %v1824_v0, %v869_v2  ;;  %v924_v4 = vmul.f32 0.5, %v856_v23 }
 0x31a   : > { %v888_v48 = vmul.f32 1.0614054, %v884_v44  ;;  %v882_v49 = vsub.f32 2.0, %v878_v46 }
 0x31b   : > { %v887_v51 = vmul.f32 1.0614054, %v883_v61  ;;  %v881_v53 = vsub.f32 2.0, %v877_v47 }
 0x31c   : > { %v892_v55 = vadd.f32 -1.4531521, %v888_v48  ;;  %v886_v60 = vmul.f32 %v1822_v41, %v882_v49 }
 0x31d   : > { %v891_v63 = vadd.f32 -1.4531521, %v887_v51  ;;  %v885_v1 = vmul.f32 %v1824_v0, %v881_v53  ;;  %v1826_v0 = vpop.eup %1825 }
 0x31e   : > { %v896_v3 = vmul.f32 %v892_v55, %v884_v44  ;;  %v890_v5 = vmul.f32 1.0614054, %v886_v60  ;;  %v1828_v47 = vpop.eup %1827 }
 0x31f   : > { %v895_v7 = vmul.f32 %v891_v63, %v883_v61  ;;  %v889_v8 = vmul.f32 1.0614054, %v885_v1  ;;  %v1830_v53 = vpop.eup %1829 }
 0x320   : > { %v900_v10 = vadd.f32 1.4214138, %v896_v3  ;;  %v894_v12 = vadd.f32 -1.4531521, %v890_v5  ;;  %v1832_v62 = vpop.eup %1831 }
 0x321   : > { %v899_v14 = vadd.f32 1.4214138, %v895_v7  ;;  %v893_v15 = vadd.f32 -1.4531521, %v889_v8  ;;  %v1176_v8 = vld [vmem:[%s2315_s9 + $0x28] sm:$0xff] }
 0x322   : > { %v904_v16 = vmul.f32 %v900_v10, %v884_v44  ;;  %v898_v17 = vmul.f32 %v894_v12, %v886_v60  ;;  %v1745_v10 = vpack.c.bf16 %v1176_v8, %v1175_v9  ;;  %v1178_v12 = vld [vmem:[%s2315_s9 + $0x38] sm:$0xff] }
 0x323   : > { %v903_v18 = vmul.f32 %v899_v14, %v883_v61  ;;  %v897_v26 = vmul.f32 %v893_v15, %v885_v1  ;;  %v1749_v13 = vpack.c.bf16 %v1178_v12, %v1177_v11  ;;  %v1179_v14 = vld [vmem:[%s2315_s9 + $0x40] sm:$0xff]  ;;  %v1180_v15 = vld [vmem:[%s2315_s9 + $0x48] sm:$0xff] }
 0x324   : > { %v908_v27 = vadd.f32 -0.28449672, %v904_v16  ;;  %v902_v22 = vadd.f32 1.4214138, %v898_v17  ;;  %v1753_v16 = vpack.c.bf16 %v1180_v15, %v1179_v14  ;;  %v1181_v17 = vld [vmem:[%s2315_s9 + $0x50] sm:$0xff] }
 0x325   : > { %v907_v30 = vadd.f32 -0.28449672, %v903_v18  ;;  %v901_v25 = vadd.f32 1.4214138, %v897_v26  ;;  %v1182_v18 = vld [vmem:[%s2315_s9 + $0x58] sm:$0xff]  ;;  %v1183_v26 = vld [vmem:[%s2315_s9 + $0x60] sm:$0xff] }
 0x326   : > { %v912_v32 = vmul.f32 %v908_v27, %v884_v44  ;;  %v906_v33 = vmul.f32 %v902_v22, %v886_v60  ;;  %v1757_v20 = vpack.c.bf16 %v1182_v18, %v1181_v17  ;;  %v1184_v27 = vld [vmem:[%s2315_s9 + $0x68] sm:$0xff] }
 0x327   : > { %v911_v34 = vmul.f32 %v907_v30, %v883_v61  ;;  %v905_v38 = vmul.f32 %v901_v25, %v885_v1  ;;  %v1761_v22 = vpack.c.bf16 %v1184_v27, %v1183_v26  ;;  %v1186_v30 = vld [vmem:[%s2315_s9 + $0x78] sm:$0xff] }
 0x328   : > { %v916_v36 = vadd.f32 0.2548296, %v912_v32  ;;  %v910_v35 = vadd.f32 -0.28449672, %v906_v33  ;;  %v1765_v25 = vpack.c.bf16 %v1186_v30, %v1185_v29  ;;  %v1383_v32 = vld [vmem:[%s2314_s8] ss:$0 sm:$0xff] }
 0x329   : > { %v915_v39 = vadd.f32 0.2548296, %v911_v34  ;;  %v909_v2 = vadd.f32 -0.28449672, %v905_v38 }
 0x32a   : > { %v920_v37 = vmul.f32 %v916_v36, %v884_v44  ;;  %v914_v40 = vmul.f32 %v910_v35, %v886_v60  ;;  %v926_v44 = vmul.f32 0.5, %v858_v58 }
 0x32b   : > { %v919_v56 = vmul.f32 %v915_v39, %v883_v61  ;;  %v913_v41 = vmul.f32 %v909_v2, %v885_v1  ;;  %v925_v61 = vmul.f32 0.5, %v857_v31  ;;  %v1172_v31 = vld [vmem:[%s2315_s9 + $0x8] sm:$0xff] }
 0x32c   : > { %v928_v42 = vmul.f32 %v924_v4, %v920_v37  ;;  %v918_v43 = vadd.f32 0.2548296, %v914_v40  ;;  %v1737_v6 = vpack.c.bf16 %v1172_v31, %v1171_v19 }
 0x32d   : > { %v927_v45 = vmul.f32 %v923_v54, %v919_v56  ;;  %v917_v46 = vadd.f32 0.2548296, %v913_v41 }
 0x32e   : > { %v948_v48 = vmul.f32 %v1826_v0, %v928_v42  ;;  %v922_v49 = vmul.f32 %v918_v43, %v886_v60  ;;  %v953_v60 = vmax.f32 %v2192_v57, 0.0  ;;  %1738 = vmatprep.subr.bf16.mxu0 %v1737_v6  ;;  %v1174_v57 = vld [vmem:[%s2315_s9 + $0x18] sm:$0xff] }
 0x32f   : > { %v921_v23 = vmul.f32 %v917_v46, %v885_v1  ;;  %v947_v51 = vmul.f32 %v1828_v47, %v927_v45  ;;  %1740 = vmatpush3.bf16.msra.mxu0 %v1737_v6  ;;  %v1741_v7 = vpack.c.bf16 %v1174_v57, %v1173_v28 }
 0x330   : > { %v930_v52 = vmul.f32 %v926_v44, %v922_v49  ;;  %v956_v63 = vsub.f32 %v952_v24, %v948_v48 }
 0x331   : > { %v929_v55 = vmul.f32 %v925_v61, %v921_v23  ;;  %v955_v59 = vsub.f32 %v951_v50, %v947_v51  ;;  %1742 = vmatprep.subr.bf16.mxu0 %v1741_v7 }
 0x332   : > { %v950_v3 = vmul.f32 %v1830_v53, %v930_v52 }
 0x333   : > { %1591 = vmatprep.mubr.f32.mxu1 %v955_v59  ;;  %v949_v58 = vmul.f32 %v1832_v62, %v929_v55  ;;  %1744 = vmatpush3.bf16.msra.mxu0 %v1741_v7 }
 0x334   : > { %1592 = vmatmul.mubr.f32.vlgmr.msra.gmra.mrb[4].mxu1 %v956_v63  ;;  %v958_v5 = vsub.f32 %v954_v21, %v950_v3  ;;  %1746 = vmatprep.subr.bf16.mxu0 %v1745_v10 }
 0x335   : > { %v957_v1 = vsub.f32 %v953_v60, %v949_v58 }
 0x337   : > { %1594 = vmatprep.mubr.f32.mxu1 %v957_v1  ;;  %1748 = vmatpush3.bf16.msra.mxu0 %v1745_v10 }
 0x338   : > { %1595 = vmatmul.mubr.f32.gmra.mrb[6].mxu1 %v958_v5  ;;  %1750 = vmatprep.subr.bf16.mxu0 %v1749_v13 }
 0x33b   : > { %1752 = vmatpush3.bf16.msra.mxu0 %v1749_v13 }
 0x33c   : > { %1754 = vmatprep.subr.bf16.mxu0 %v1753_v16 }
 0x33f   : > { %1756 = vmatpush3.bf16.msra.mxu0 %v1753_v16 }
 0x340   : > { %1758 = vmatprep.subr.bf16.mxu0 %v1757_v20 }
 0x343   : > { %1760 = vmatpush3.bf16.msra.mxu0 %v1757_v20 }
 0x344   : > { %1762 = vmatprep.subr.bf16.mxu0 %v1761_v22 }
 0x347   : > { %1764 = vmatpush3.bf16.msra.mxu0 %v1761_v22 }
 0x348   : > { %1766 = vmatprep.subr.bf16.mxu0 %v1765_v25 }
 0x34b   : > { %1768 = vmatpush3.bf16.msra.mxu0 %v1765_v25 }
 0x407   : > { %v1593_v33 = vpop.f32.mrb[4].mxu1 }
 0x408   : > { %v2263_v34 = vadd.f32 %v1593_v33, %v1383_v32  ;;  %v1048_v38 = vpop.f32.mrb[5].mxu1 }
 0x409   : > { %v2265_v36 = vadd.f32 %v1383_v32, %v1048_v38 }
 0x40a   : > { %v1068_v35 = vand.u32 2147483647, %v2263_v34 }
 0x40b   : > { %v1067_v39 = vand.u32 2147483647, %v2265_v36  ;;  %v1596_v2 = vpop.f32.mrb[6].mxu1 }
 0x40c   : > { %v1072_v37 = vmul.f32 0.70710677, %v1068_v35  ;;  %v2271_v4 = vadd.f32 %v1596_v2, %v1383_v32  ;;  %v1058_v40 = vpop.f32.mrb[7].mxu1 }
 0x40d   : > { %v1071_v56 = vmul.f32 0.70710677, %v1067_v39  ;;  %v2275_v54 = vadd.f32 %v1383_v32, %v1058_v40 }
 0x40e   : > { %v1076_v41 = vmul.f32 0.3275911, %v1072_v37  ;;  %v1070_v42 = vand.u32 2147483647, %v2271_v4  ;;  %v1144_v59 = vsub.f32 0.0, %v1072_v37 }
 0x40f   : > { %v1075_v43 = vmul.f32 0.3275911, %v1071_v56  ;;  %v1069_v0 = vand.u32 2147483647, %v2275_v54  ;;  %v1143_v60 = vsub.f32 0.0, %v1071_v56 }
 0x410   : > { %v1080_v45 = vadd.f32 1.0, %v1076_v41  ;;  %v1074_v46 = vmul.f32 0.70710677, %v1070_v42  ;;  %v1148_v31 = vmul.f32 %v1144_v59, %v1072_v37 }
 0x411   : > { %v1079_v47 = vadd.f32 1.0, %v1075_v43  ;;  %v1073_v48 = vmul.f32 0.70710677, %v1069_v0  ;;  %v1147_v9 = vmul.f32 %v1143_v60, %v1071_v56 }
 0x412   : > { %1833 = vrcp.f32 %v1080_v45  ;;  %v1078_v49 = vmul.f32 0.3275911, %v1074_v46  ;;  %v1146_v28 = vsub.f32 0.0, %v1074_v46  ;;  %v1153_v15 = vmul.f32 1.442695, %v1148_v31 }
 0x413   : > { %1835 = vrcp.f32 %v1079_v47  ;;  %v1077_v44 = vmul.f32 0.3275911, %v1073_v48  ;;  %v1145_v10 = vsub.f32 0.0, %v1073_v48  ;;  %v1151_v26 = vmul.f32 1.442695, %v1147_v9 }
 0x414   : > { %v1082_v50 = vadd.f32 1.0, %v1078_v49  ;;  %v1150_v17 = vmul.f32 %v1146_v28, %v1074_v46  ;;  %v1163_v31 = vmax.f32 %v2265_v36, 0.0  ;;  %v1166_v36 = vmax.f32 %v2271_v4, 0.0 }
 0x415   : > { %v1081_v23 = vadd.f32 1.0, %v1077_v44  ;;  %v1149_v22 = vmul.f32 %v1145_v10, %v1073_v48 }
 0x416   : > { %1837 = vrcp.f32 %v1082_v50  ;;  %v1157_v38 = vmul.f32 1.442695, %v1150_v17 }
 0x417   : > { %1839 = vrcp.f32 %v1081_v23  ;;  %v1155_v56 = vmul.f32 1.442695, %v1149_v22 }
 0x418   : > { %1841 = vpow2.f32 %v1153_v15 }
 0x419   : > { %1843 = vpow2.f32 %v1151_v26 }
 0x41a   : > { %1845 = vpow2.f32 %v1157_v38 }
 0x41b   : > { %1847 = vpow2.f32 %v1155_v56 }
 0x41c   : > { %v1834_v61 = vpop.eup %1833 }
 0x41d   : > { %v1836_v51 = vpop.eup %1835  ;;  %v1088_v24 = vmul.f32 %v1834_v61, %v1080_v45 }
 0x41e   : > { %v1087_v52 = vmul.f32 %v1836_v51, %v1079_v47 }
 0x41f   : > { %v1092_v53 = vsub.f32 2.0, %v1088_v24 }
 0x420   : > { %v1838_v55 = vpop.eup %1837  ;;  %v1091_v62 = vsub.f32 2.0, %v1087_v52 }
 0x421   : > { %v1840_v63 = vpop.eup %1839  ;;  %v1096_v3 = vmul.f32 %v1834_v61, %v1092_v53  ;;  %v1090_v58 = vmul.f32 %v1838_v55, %v1082_v50  ;;  %v1135_v53 = vmul.f32 0.5, %v1067_v39  ;;  %v1164_v39 = vmax.f32 %v2263_v34, 0.0  ;;  %v1384_v34 = vld [vmem:[%s2316_s10] ss:$0 sm:$0xff] }
 0x422   : > { %v1095_v21 = vmul.f32 %v1836_v51, %v1091_v62  ;;  %v1089_v1 = vmul.f32 %v1840_v63, %v1081_v23  ;;  %v1136_v51 = vmul.f32 0.5, %v1068_v35 }
 0x423   : > { %v1100_v5 = vmul.f32 1.0614054, %v1096_v3  ;;  %v1094_v19 = vsub.f32 2.0, %v1090_v58 }
 0x424   : > { %v1099_v6 = vmul.f32 1.0614054, %v1095_v21  ;;  %v1093_v57 = vsub.f32 2.0, %v1089_v1 }
 0x425   : > { %v1104_v7 = vadd.f32 -1.4531521, %v1100_v5  ;;  %v1098_v8 = vmul.f32 %v1838_v55, %v1094_v19 }
 0x426   : > { %v1103_v11 = vadd.f32 -1.4531521, %v1099_v6  ;;  %v1097_v12 = vmul.f32 %v1840_v63, %v1093_v57  ;;  %v1842_v63 = vpop.eup %1841 }
 0x427   : > { %v1108_v13 = vmul.f32 %v1104_v7, %v1096_v3  ;;  %v1102_v14 = vmul.f32 1.0614054, %v1098_v8  ;;  %v1844_v1 = vpop.eup %1843 }
 0x428   : > { %v1107_v16 = vmul.f32 %v1103_v11, %v1095_v21  ;;  %v1101_v18 = vmul.f32 1.0614054, %v1097_v12  ;;  %v1846_v57 = vpop.eup %1845 }
 0x429   : > { %v1112_v20 = vadd.f32 1.4214138, %v1108_v13  ;;  %v1106_v27 = vadd.f32 -1.4531521, %v1102_v14  ;;  %v1848_v10 = vpop.eup %1847  ;;  %v1165_v13 = vmax.f32 %v2275_v54, 0.0 }
 0x42a   : > { %v1111_v29 = vadd.f32 1.4214138, %v1107_v16  ;;  %v1105_v30 = vadd.f32 -1.4531521, %v1101_v18 }
 0x42b   : > { %v1116_v25 = vmul.f32 %v1112_v20, %v1096_v3  ;;  %v1110_v32 = vmul.f32 %v1106_v27, %v1098_v8 }
 0x42c   : > { %v1115_v33 = vmul.f32 %v1111_v29, %v1095_v21  ;;  %v1109_v2 = vmul.f32 %v1105_v30, %v1097_v12 }
 0x42d   : > { %v1120_v37 = vadd.f32 -0.28449672, %v1116_v25  ;;  %v1114_v40 = vadd.f32 1.4214138, %v1110_v32 }
 0x42e   : > { %v1119_v41 = vadd.f32 -0.28449672, %v1115_v33  ;;  %v1113_v43 = vadd.f32 1.4214138, %v1109_v2 }
 0x42f   : > { %v1124_v45 = vmul.f32 %v1120_v37, %v1096_v3  ;;  %v1118_v46 = vmul.f32 %v1114_v40, %v1098_v8 }
 0x430   : > { %v1123_v47 = vmul.f32 %v1119_v41, %v1095_v21  ;;  %v1117_v49 = vmul.f32 %v1113_v43, %v1097_v12 }
 0x431   : > { %v1128_v48 = vadd.f32 0.2548296, %v1124_v45  ;;  %v1122_v44 = vadd.f32 -0.28449672, %v1118_v46 }
 0x432   : > { %v1127_v50 = vadd.f32 0.2548296, %v1123_v47  ;;  %v1121_v23 = vadd.f32 -0.28449672, %v1117_v49 }
 0x433   : > { %v1132_v61 = vmul.f32 %v1128_v48, %v1096_v3  ;;  %v1126_v24 = vmul.f32 %v1122_v44, %v1098_v8  ;;  %v1138_v3 = vmul.f32 0.5, %v1070_v42 }
 0x434   : > { %v1131_v52 = vmul.f32 %v1127_v50, %v1095_v21  ;;  %v1125_v55 = vmul.f32 %v1121_v23, %v1097_v12  ;;  %v1137_v21 = vmul.f32 0.5, %v1069_v0 }
 0x435   : > { %v1140_v59 = vmul.f32 %v1136_v51, %v1132_v61  ;;  %v1130_v62 = vadd.f32 0.2548296, %v1126_v24 }
 0x436   : > { %v1139_v60 = vmul.f32 %v1135_v53, %v1131_v52  ;;  %v1129_v58 = vadd.f32 0.2548296, %v1125_v55 }
 0x437   : > { %v1160_v5 = vmul.f32 %v1842_v63, %v1140_v59  ;;  %v1134_v19 = vmul.f32 %v1130_v62, %v1098_v8 }
 0x438   : > { %v1133_v35 = vmul.f32 %v1129_v58, %v1097_v12  ;;  %v1159_v6 = vmul.f32 %v1844_v1, %v1139_v60 }
 0x439   : > { %v1142_v28 = vmul.f32 %v1138_v3, %v1134_v19  ;;  %v1168_v11 = vsub.f32 %v1164_v39, %v1160_v5 }
 0x43a   : > { %v1141_v7 = vmul.f32 %v1137_v21, %v1133_v35  ;;  %v1167_v9 = vsub.f32 %v1163_v31, %v1159_v6 }
 0x43b   : > { %v1162_v8 = vmul.f32 %v1846_v57, %v1142_v28 }
 0x43c   : > { %1629 = vmatprep.mubr.f32.mxu0 %v1167_v9  ;;  %v1161_v42 = vmul.f32 %v1848_v10, %v1141_v7 }
 0x43d   : > { %1630 = vmatmul.mubr.f32.vlgmr.msra.gmra.mrb[8].mxu0 %v1168_v11  ;;  %v1170_v0 = vsub.f32 %v1166_v36, %v1162_v8 }
 0x43e   : > { %v1169_v12 = vsub.f32 %v1165_v13, %v1161_v42 }
 0x440   : > { %1632 = vmatprep.mubr.f32.mxu0 %v1169_v12 }
 0x441   : > { %1633 = vmatmul.mubr.f32.gmra.mrb[10].mxu0 %v1170_v0 }
 0x510   : > { %v1631_v14 = vpop.f32.mrb[8].mxu0 }
 0x511   : > { %v1260_v54 = vpop.f32.mrb[9].mxu0  ;;  %v1266_v16 = vadd.f32 %v1631_v14, %v1384_v34 }
 0x512   : > { %v1261_v15 = vadd.f32 %v1384_v34, %v1260_v54 }
 0x513   : > { %1281 = vst.msk [vmem:[%s418_s22 + $0x8] sm:$0xff] %vm1279_vm4, %v1266_v16 }
 0x514   : > { %1280 = vst.msk [vmem:[%s418_s22] sm:$0xff] %vm1279_vm4, %v1261_v15  ;;  %v1634_v4 = vpop.f32.mrb[10].mxu0 }
 0x515   : > { %v1270_v17 = vpop.f32.mrb[11].mxu0  ;;  %v1276_v20 = vadd.f32 %v1634_v4, %v1384_v34 }
 0x516   : > { %v1271_v18 = vadd.f32 %v1384_v34, %v1270_v17 }
 0x517   : > { %1283 = vst.msk [vmem:[%s418_s22 + $0x18] sm:$0xff] %vm1279_vm4, %v1276_v20 }
 0x518   : > { %1282 = vst.msk [vmem:[%s418_s22 + $0x10] sm:$0xff] %vm1279_vm4, %v1271_v18 }
 0x519 PF: > { %s23_s17 = sadd.s32 1, %s1919_s17  }
 0x51a   : > { %p20_p5 = scmp.ge.s32.totalorder %s23_s17, 4  }
 0x51c   :  { %22 = sbr.rel (!%p20_p5) target bundleno = 2 (0x2), region = 103 }
 0x523   :  { %1306 = vsyncpa [#allocation3], 1 }
 0x524   :  { %1308 = vsyncpa [#allocation3 + $0x1], 1 }
 0x525   :  { %1309 = vsyncpa [#allocation5], 1 }

</bundles_post_ra>
